<compile_context>
chip_gen: v5e
topology: v5e:2x2
jax: 0.10.0
libtpu: 0.0.40
codegen_flags: <defaults>
</compile_context>

<pallas_src>
import functools

import jax
import jax.numpy as jnp
import numpy as np
from jax.experimental import pallas as pl
from jax.experimental.pallas import tpu as pltpu


# ---------------------------------------------------------------------------
# Fast path: embedding table resident in VMEM; gather = dynamic vector loads.
# ---------------------------------------------------------------------------
def _resident_table_kernel(ids_ref, emb_ref, pos_ref, out_ref, rows_ref, *,
                           seq_len, seq_tile, vocab_size):
    st = pl.program_id(0)                  # sequence-tile index (slow axis)
    b = pl.program_id(1)                   # batch index (fast axis)
    base = b * seq_len + st * seq_tile     # flat index of first token in tile

    # Gather: one dynamic (1, D) row load per token from the VMEM-resident
    # table into the staging tile.  seq_tile is static, so the loop is fully
    # unrolled Python (destination offsets static, source offsets dynamic).
    for r in range(seq_tile):
        tok = ids_ref[base + r]
        tok = jnp.maximum(jnp.minimum(tok, vocab_size - 1), 0)  # clamp OOB ids
        rows_ref[pl.ds(r, 1), :] = emb_ref[pl.ds(tok, 1), :]

    # token embedding + positional embedding: one VPU add, lane-dense store.
    out_ref[0, :, :] = rows_ref[...] + pos_ref[...]


# ---------------------------------------------------------------------------
# Fallback path: table stays in HBM; row gathers are manual DMAs,
# double-buffered across grid steps with one DMA semaphore per buffer slot.
# Relies on sequential grid execution -> dimension_semantics = "arbitrary".
# ---------------------------------------------------------------------------
def _hbm_gather_kernel(ids_ref, emb_hbm, pos_ref, out_ref, rows_ref, sems, *,
                       seq_len, seq_tile, vocab_size):
    st = pl.program_id(0)
    b = pl.program_id(1)
    nb = pl.num_programs(1)
    n_steps = pl.num_programs(0) * nb
    step = st * nb + b                     # linear grid-step index (b fastest)
    slot = step % 2

    def row_copy(step_idx, slot_idx, r):
        st_i = step_idx // nb
        b_i = step_idx - st_i * nb
        base = b_i * seq_len + st_i * seq_tile
        tok = ids_ref[base + r]
        tok = jnp.maximum(jnp.minimum(tok, vocab_size - 1), 0)
        return pltpu.make_async_copy(
            emb_hbm.at[tok], rows_ref.at[slot_idx, r], sems.at[slot_idx])

    def issue(step_idx, slot_idx):
        for r in range(seq_tile):          # static trip count -> fully unrolled
            row_copy(step_idx, slot_idx, r).start()

    def wait(step_idx, slot_idx):
        # Per-row waits against the slot's single shared semaphore, each using
        # the true source descriptor.  After all seq_tile waits, every row of
        # this slot has landed (robust regardless of completion order).
        for r in range(seq_tile):
            row_copy(step_idx, slot_idx, r).wait()

    # Prime the pipeline on the very first grid step.
    @pl.when(step == 0)
    def _():
        issue(0, 0)

    # Prefetch the NEXT tile's rows into the other slot before waiting on the
    # current one, so gather latency overlaps this tile's add + writeback.
    @pl.when(step + 1 < n_steps)
    def _():
        issue(step + 1, 1 - slot)

    wait(step, slot)
    out_ref[0, :, :] = rows_ref[slot] + pos_ref[...]


# ---------------------------------------------------------------------------
# Helpers
# ---------------------------------------------------------------------------
def _pick_seq_tile(seq_len, d_model, *, max_tile,
                   vmem_budget_bytes=16 * 1024 * 1024):
    """Largest legal sequence tile.

    Legal = divides seq_len and (TS == seq_len or TS % 8 == 0), so the
    (8, 128) BlockSpec constraint always holds.  Capped by a VMEM working-set
    budget (~6 * TS * D * 4 bytes for double-buffered out/pos tiles + row
    scratch) and by `max_tile` (bounds in-flight row DMAs on the HBM path).
    """
    cap = max(8, vmem_budget_bytes // (6 * d_model * 4))
    cap = min(cap, max_tile)
    if seq_len <= cap:
        return seq_len
    best = 0
    for cand in range(8, cap + 1, 8):
        if seq_len % cand == 0:
            best = cand
    # No divisor that is a multiple of 8: fall back to the whole sequence
    # (block == full dim is always layout-legal).
    return best if best > 0 else seq_len


def make_positional_embedding(max_len, d_model):
    # Mirrors PositionalEmbedding.__init__ math (and handles odd d_model).
    position = jnp.arange(0, max_len, dtype=jnp.float32)[:, None]      # (L, 1)
    term = jnp.arange(0, d_model, 2, dtype=jnp.float32)
    div_term = jnp.power(jnp.float32(10000.0), term / d_model)
    angles = position / div_term                                        # (L, ceil(D/2))
    pos_emb = jnp.zeros((max_len, d_model), dtype=jnp.float32)
    pos_emb = pos_emb.at[:, 0::2].set(jnp.sin(angles))
    pos_emb = pos_emb.at[:, 1::2].set(jnp.cos(angles)[:, : d_model // 2])
    return pos_emb  # (max_len, d_model)


# ---------------------------------------------------------------------------
# Wrapper
# ---------------------------------------------------------------------------
def data_embedding(x_ids, emb_table, pos_emb, *,
                   table_vmem_budget_bytes=24 * 1024 * 1024,
                   force_hbm_gather=False):
    """x_ids: (B, S) int, emb_table: (V, D), pos_emb: (max_len, D)."""
    B, S = x_ids.shape
    V, D = emb_table.shape
    dtype = emb_table.dtype
    itemsize = jnp.dtype(dtype).itemsize
    pos_slice = pos_emb[:S, :].astype(dtype)          # like pos_emb[:, :x.size(1)]
    ids_flat = x_ids.reshape(-1).astype(jnp.int32)    # (B*S,) -> SMEM prefetch

    table_bytes = V * D * itemsize
    use_resident = (not force_hbm_gather) and table_bytes <= table_vmem_budget_bytes

    if use_resident:
        # -------- fast path: table resident in VMEM --------
        TS = _pick_seq_tile(S, D, max_tile=512)
        tile_bytes = TS * D * itemsize
        vmem_limit = int(min(100 << 20,
                             max(32 << 20,
                                 2 * table_bytes + 6 * tile_bytes + (4 << 20))))
        kernel = functools.partial(_resident_table_kernel,
                                   seq_len=S, seq_tile=TS, vocab_size=V)
        out = pl.pallas_call(
            kernel,
            out_shape=jax.ShapeDtypeStruct((B, S, D), dtype),
            grid_spec=pltpu.PrefetchScalarGridSpec(
                num_scalar_prefetch=1,                      # token ids -> SMEM
                grid=(S // TS, B),                          # batch innermost
                in_specs=[
                    # constant index map -> table fetched once, stays resident
                    pl.BlockSpec((V, D), lambda st, b, ids: (0, 0)),
                    # pos block constant across the fast (batch) axis
                    pl.BlockSpec((TS, D), lambda st, b, ids: (st, 0)),
                ],
                out_specs=pl.BlockSpec((1, TS, D), lambda st, b, ids: (b, st, 0)),
                scratch_shapes=[pltpu.VMEM((TS, D), dtype)],   # gathered rows
            ),
            compiler_params=pltpu.CompilerParams(
                dimension_semantics=("parallel", "parallel"),
                vmem_limit_bytes=vmem_limit,
            ),
        )(ids_flat, emb_table, pos_slice)
    else:
        # -------- fallback: HBM row gather, double-buffered across steps ----
        TS = _pick_seq_tile(S, D, max_tile=128)   # bounds in-flight row DMAs
        tile_bytes = TS * D * itemsize
        vmem_limit = int(min(100 << 20,
                             max(32 << 20, 8 * tile_bytes + (4 << 20))))
        kernel = functools.partial(_hbm_gather_kernel,
                                   seq_len=S, seq_tile=TS, vocab_size=V)
        out = pl.pallas_call(
            kernel,
            out_shape=jax.ShapeDtypeStruct((B, S, D), dtype),
            grid_spec=pltpu.PrefetchScalarGridSpec(
                num_scalar_prefetch=1,
                grid=(S // TS, B),
                in_specs=[
                    pl.BlockSpec(memory_space=pl.ANY),               # table in HBM
                    pl.BlockSpec((TS, D), lambda st, b, ids: (st, 0)),
                ],
                out_specs=pl.BlockSpec((1, TS, D), lambda st, b, ids: (b, st, 0)),
                scratch_shapes=[
                    pltpu.VMEM((2, TS, D), dtype),        # double-buffered rows
                    pltpu.SemaphoreType.DMA((2,)),        # one sem per slot
                ],
            ),
            compiler_params=pltpu.CompilerParams(
                # Cross-grid-step double buffering needs sequential execution.
                dimension_semantics=("arbitrary", "arbitrary"),
                vmem_limit_bytes=vmem_limit,
            ),
        )(ids_flat, emb_table, pos_slice)

    # Dropout (p=0.1) in eval/inference mode == identity.
    return out


if __name__ == "__main__":
    # Small shapes consistent with the module (D=128 keeps the output lane-dense).
    B, S = 2, 8
    max_len = 16
    d_model = 128
    vocab_size = 64

    key = jax.random.PRNGKey(0)
    k_ids, k_emb = jax.random.split(key)

    x_ids = jax.random.randint(k_ids, (B, S), 0, vocab_size, dtype=jnp.int32)
    emb_table = jax.random.normal(k_emb, (vocab_size, d_model), dtype=jnp.float32)
    pos_emb = make_positional_embedding(max_len, d_model)

    # Pure-JAX reference: token_embedding(x) + pos_emb[:, :S]
    ref = emb_table[x_ids] + pos_emb[None, :S, :]

    # Fast path (VMEM-resident table).
    out = data_embedding(x_ids, emb_table, pos_emb)
    out = jax.block_until_ready(out)
    np.testing.assert_allclose(np.asarray(out), np.asarray(ref),
                               rtol=1e-6, atol=1e-6)

    # Large-vocab fallback (HBM gather, cross-step double buffering): force it
    # so this path is also compiled, executed and verified.
    out2 = data_embedding(x_ids, emb_table, pos_emb, force_hbm_gather=True)
    out2 = jax.block_until_ready(out2)
    np.testing.assert_allclose(np.asarray(out2), np.asarray(ref),
                               rtol=1e-6, atol=1e-6)

    print("KERNEL_OK")
</pallas_src>

<mosaic_0001>
module attributes {stable_mosaic.version = 11 : i64} {
  func.func @_resident_table_kernel(%arg0: i32, %arg1: i32, %arg2: memref<16xi32, #tpu.memory_space<smem>>, %arg3: memref<64x128xf32, #tpu.memory_space<vmem>>, %arg4: memref<8x128xf32, #tpu.memory_space<vmem>>, %arg5: memref<1x8x128xf32, #tpu.memory_space<vmem>>, %arg6: memref<8x128xf32, #tpu.memory_space<vmem>>) attributes {dimension_semantics = [#tpu.dimension_semantics<parallel>, #tpu.dimension_semantics<parallel>], iteration_bounds = array<i64: 1, 2>, scalar_prefetch = 1 : i64, scratch_operands = 1 : i64, tpu.core_type = #tpu.core_type<tc>, window_params = [{pipeline_mode = #tpu.pipeline_mode<synchronous>, transform_indices = @transform_0, window_bounds = array<i64: 64, 128>}, {transform_indices = @transform_1, window_bounds = array<i64: 8, 128>}, {transform_indices = @transform_2, window_bounds = array<i64: 1, 8, 128>}]} {
    %c8_i32 = arith.constant 8 : i32
    %0 = arith.muli %arg1, %c8_i32 : i32
    %c8_i32_0 = arith.constant 8 : i32
    %1 = arith.muli %arg0, %c8_i32_0 : i32
    %2 = arith.addi %0, %1 : i32
    %c0_i32 = arith.constant 0 : i32
    %3 = arith.addi %2, %c0_i32 : i32
    %4 = arith.index_cast %3 : i32 to index
    %5 = memref.load %arg2[%4] : memref<16xi32, #tpu.memory_space<smem>>
    %c63_i32 = arith.constant 63 : i32
    %6 = arith.minsi %5, %c63_i32 : i32
    %c0_i32_1 = arith.constant 0 : i32
    %7 = arith.maxsi %6, %c0_i32_1 : i32
    %8 = arith.index_cast %7 : i32 to index
    %c0 = arith.constant 0 : index
    %9 = vector.load %arg3[%8, %c0] : memref<64x128xf32, #tpu.memory_space<vmem>>, vector<1x128xf32>
    %c0_2 = arith.constant 0 : index
    %c0_3 = arith.constant 0 : index
    %10 = vector.load %arg6[%c0_2, %c0_3] : memref<8x128xf32, #tpu.memory_space<vmem>>, vector<1x128xf32>
    tpu.vector_store %arg6[%c0_2, %c0_3], %9 {strides = array<i32>} : memref<8x128xf32, #tpu.memory_space<vmem>>, vector<1x128xf32>,
    %c1_i32 = arith.constant 1 : i32
    %11 = arith.addi %2, %c1_i32 : i32
    %12 = arith.index_cast %11 : i32 to index
    %13 = memref.load %arg2[%12] : memref<16xi32, #tpu.memory_space<smem>>
    %c63_i32_4 = arith.constant 63 : i32
    %14 = arith.minsi %13, %c63_i32_4 : i32
    %c0_i32_5 = arith.constant 0 : i32
    %15 = arith.maxsi %14, %c0_i32_5 : i32
    %16 = arith.index_cast %15 : i32 to index
    %c0_6 = arith.constant 0 : index
    %17 = vector.load %arg3[%16, %c0_6] : memref<64x128xf32, #tpu.memory_space<vmem>>, vector<1x128xf32>
    %c1 = arith.constant 1 : index
    %c0_7 = arith.constant 0 : index
    %18 = vector.load %arg6[%c1, %c0_7] : memref<8x128xf32, #tpu.memory_space<vmem>>, vector<1x128xf32>
    tpu.vector_store %arg6[%c1, %c0_7], %17 {strides = array<i32>} : memref<8x128xf32, #tpu.memory_space<vmem>>, vector<1x128xf32>,
    %c2_i32 = arith.constant 2 : i32
    %19 = arith.addi %2, %c2_i32 : i32
    %20 = arith.index_cast %19 : i32 to index
    %21 = memref.load %arg2[%20] : memref<16xi32, #tpu.memory_space<smem>>
    %c63_i32_8 = arith.constant 63 : i32
    %22 = arith.minsi %21, %c63_i32_8 : i32
    %c0_i32_9 = arith.constant 0 : i32
    %23 = arith.maxsi %22, %c0_i32_9 : i32
    %24 = arith.index_cast %23 : i32 to index
    %c0_10 = arith.constant 0 : index
    %25 = vector.load %arg3[%24, %c0_10] : memref<64x128xf32, #tpu.memory_space<vmem>>, vector<1x128xf32>
    %c2 = arith.constant 2 : index
    %c0_11 = arith.constant 0 : index
    %26 = vector.load %arg6[%c2, %c0_11] : memref<8x128xf32, #tpu.memory_space<vmem>>, vector<1x128xf32>
    tpu.vector_store %arg6[%c2, %c0_11], %25 {strides = array<i32>} : memref<8x128xf32, #tpu.memory_space<vmem>>, vector<1x128xf32>,
    %c3_i32 = arith.constant 3 : i32
    %27 = arith.addi %2, %c3_i32 : i32
    %28 = arith.index_cast %27 : i32 to index
    %29 = memref.load %arg2[%28] : memref<16xi32, #tpu.memory_space<smem>>
    %c63_i32_12 = arith.constant 63 : i32
    %30 = arith.minsi %29, %c63_i32_12 : i32
    %c0_i32_13 = arith.constant 0 : i32
    %31 = arith.maxsi %30, %c0_i32_13 : i32
    %32 = arith.index_cast %31 : i32 to index
    %c0_14 = arith.constant 0 : index
    %33 = vector.load %arg3[%32, %c0_14] : memref<64x128xf32, #tpu.memory_space<vmem>>, vector<1x128xf32>
    %c3 = arith.constant 3 : index
    %c0_15 = arith.constant 0 : index
    %34 = vector.load %arg6[%c3, %c0_15] : memref<8x128xf32, #tpu.memory_space<vmem>>, vector<1x128xf32>
    tpu.vector_store %arg6[%c3, %c0_15], %33 {strides = array<i32>} : memref<8x128xf32, #tpu.memory_space<vmem>>, vector<1x128xf32>,
    %c4_i32 = arith.constant 4 : i32
    %35 = arith.addi %2, %c4_i32 : i32
    %36 = arith.index_cast %35 : i32 to index
    %37 = memref.load %arg2[%36] : memref<16xi32, #tpu.memory_space<smem>>
    %c63_i32_16 = arith.constant 63 : i32
    %38 = arith.minsi %37, %c63_i32_16 : i32
    %c0_i32_17 = arith.constant 0 : i32
    %39 = arith.maxsi %38, %c0_i32_17 : i32
    %40 = arith.index_cast %39 : i32 to index
    %c0_18 = arith.constant 0 : index
    %41 = vector.load %arg3[%40, %c0_18] : memref<64x128xf32, #tpu.memory_space<vmem>>, vector<1x128xf32>
    %c4 = arith.constant 4 : index
    %c0_19 = arith.constant 0 : index
    %42 = vector.load %arg6[%c4, %c0_19] : memref<8x128xf32, #tpu.memory_space<vmem>>, vector<1x128xf32>
    tpu.vector_store %arg6[%c4, %c0_19], %41 {strides = array<i32>} : memref<8x128xf32, #tpu.memory_space<vmem>>, vector<1x128xf32>,
    %c5_i32 = arith.constant 5 : i32
    %43 = arith.addi %2, %c5_i32 : i32
    %44 = arith.index_cast %43 : i32 to index
    %45 = memref.load %arg2[%44] : memref<16xi32, #tpu.memory_space<smem>>
    %c63_i32_20 = arith.constant 63 : i32
    %46 = arith.minsi %45, %c63_i32_20 : i32
    %c0_i32_21 = arith.constant 0 : i32
    %47 = arith.maxsi %46, %c0_i32_21 : i32
    %48 = arith.index_cast %47 : i32 to index
    %c0_22 = arith.constant 0 : index
    %49 = vector.load %arg3[%48, %c0_22] : memref<64x128xf32, #tpu.memory_space<vmem>>, vector<1x128xf32>
    %c5 = arith.constant 5 : index
    %c0_23 = arith.constant 0 : index
    %50 = vector.load %arg6[%c5, %c0_23] : memref<8x128xf32, #tpu.memory_space<vmem>>, vector<1x128xf32>
    tpu.vector_store %arg6[%c5, %c0_23], %49 {strides = array<i32>} : memref<8x128xf32, #tpu.memory_space<vmem>>, vector<1x128xf32>,
    %c6_i32 = arith.constant 6 : i32
    %51 = arith.addi %2, %c6_i32 : i32
    %52 = arith.index_cast %51 : i32 to index
    %53 = memref.load %arg2[%52] : memref<16xi32, #tpu.memory_space<smem>>
    %c63_i32_24 = arith.constant 63 : i32
    %54 = arith.minsi %53, %c63_i32_24 : i32
    %c0_i32_25 = arith.constant 0 : i32
    %55 = arith.maxsi %54, %c0_i32_25 : i32
    %56 = arith.index_cast %55 : i32 to index
    %c0_26 = arith.constant 0 : index
    %57 = vector.load %arg3[%56, %c0_26] : memref<64x128xf32, #tpu.memory_space<vmem>>, vector<1x128xf32>
    %c6 = arith.constant 6 : index
    %c0_27 = arith.constant 0 : index
    %58 = vector.load %arg6[%c6, %c0_27] : memref<8x128xf32, #tpu.memory_space<vmem>>, vector<1x128xf32>
    tpu.vector_store %arg6[%c6, %c0_27], %57 {strides = array<i32>} : memref<8x128xf32, #tpu.memory_space<vmem>>, vector<1x128xf32>,
    %c7_i32 = arith.constant 7 : i32
    %59 = arith.addi %2, %c7_i32 : i32
    %60 = arith.index_cast %59 : i32 to index
    %61 = memref.load %arg2[%60] : memref<16xi32, #tpu.memory_space<smem>>
    %c63_i32_28 = arith.constant 63 : i32
    %62 = arith.minsi %61, %c63_i32_28 : i32
    %c0_i32_29 = arith.constant 0 : i32
    %63 = arith.maxsi %62, %c0_i32_29 : i32
    %64 = arith.index_cast %63 : i32 to index
    %c0_30 = arith.constant 0 : index
    %65 = vector.load %arg3[%64, %c0_30] : memref<64x128xf32, #tpu.memory_space<vmem>>, vector<1x128xf32>
    %c7 = arith.constant 7 : index
    %c0_31 = arith.constant 0 : index
    %66 = vector.load %arg6[%c7, %c0_31] : memref<8x128xf32, #tpu.memory_space<vmem>>, vector<1x128xf32>
    tpu.vector_store %arg6[%c7, %c0_31], %65 {strides = array<i32>} : memref<8x128xf32, #tpu.memory_space<vmem>>, vector<1x128xf32>,
    %c0_32 = arith.constant 0 : index
    %c0_33 = arith.constant 0 : index
    %67 = vector.load %arg6[%c0_32, %c0_33] : memref<8x128xf32, #tpu.memory_space<vmem>>, vector<8x128xf32>
    %c0_34 = arith.constant 0 : index
    %c0_35 = arith.constant 0 : index
    %68 = vector.load %arg4[%c0_34, %c0_35] : memref<8x128xf32, #tpu.memory_space<vmem>>, vector<8x128xf32>
    %69 = arith.addf %67, %68 : vector<8x128xf32>
    %c0_36 = arith.constant 0 : index
    %c0_37 = arith.constant 0 : index
    %c0_38 = arith.constant 0 : index
    %70 = vector.load %arg5[%c0_36, %c0_37, %c0_38] : memref<1x8x128xf32, #tpu.memory_space<vmem>>, vector<1x8x128xf32>
    %71 = vector.shape_cast %70 : vector<1x8x128xf32> to vector<8x128xf32>
    %72 = vector.shape_cast %69 : vector<8x128xf32> to vector<1x8x128xf32>
    tpu.vector_store %arg5[%c0_36, %c0_37, %c0_38], %72 {strides = array<i32>} : memref<1x8x128xf32, #tpu.memory_space<vmem>>, vector<1x8x128xf32>,
    return
  }
  func.func @transform_0(%arg0: i32, %arg1: i32, %arg2: memref<16xi32, #tpu.memory_space<smem>>) -> (i32, i32) {
    %c0_i32 = arith.constant 0 : i32
    %c0_i32_0 = arith.constant 0 : i32
    %c0_i32_1 = arith.constant 0 : i32
    return %c0_i32, %c0_i32_0 : i32, i32
  }
  func.func @transform_1(%arg0: i32, %arg1: i32, %arg2: memref<16xi32, #tpu.memory_space<smem>>) -> (i32, i32) {
    %c0_i32 = arith.constant 0 : i32
    %c0_i32_0 = arith.constant 0 : i32
    return %arg0, %c0_i32 : i32, i32
  }
  func.func @transform_2(%arg0: i32, %arg1: i32, %arg2: memref<16xi32, #tpu.memory_space<smem>>) -> (i32, i32, i32) {
    %c0_i32 = arith.constant 0 : i32
    %c0_i32_0 = arith.constant 0 : i32
    return %arg1, %arg0, %c0_i32 : i32, i32, i32
  }
}

</mosaic_0001>

<bundles_post_ra>
// kernel: tpu_custom_call.1
= control target key start
LH: loop header
LB: loop body
LE: loop exit
PB: predicated region body
PF: predicated region fallthrough
CT: control target
= control target key end

     0   :  { %s678_s15 = smov [#allocation4]   ;;  %s854_s0 = inlined_call_operand.hbm [shape: s32[16], index: 0, kind: input, shape index: {}]   ;;  %s855_s1 = inlined_call_operand.hbm [shape: f32[64,128], index: 1, kind: input, shape index: {}]   ;;  %s856_s2 = inlined_call_operand.hbm [shape: f32[8,128], index: 2, kind: input, shape index: {}]   ;;  %s857_s3 = inlined_call_operand.hbm [shape: f32[2,8,128], index: 3, kind: output, shape index: {}]  }
   0x1   :  { %s9_s14 = sshll.u32 %s854_s0, 4  ;;  %s10_s14 = int_to_ptr.hbm [resolvable:$true] %s9_s14 }
   0x2   :  { %12 = dma.hbm_to_smem %s10_s14, 16, %s678_s15, [#allocation3] }
   0x3   :  { %640 = dma.done.wait [#allocation3], 16 }
   0x4   :  { %641 = vsyncadd [#allocation3], 4294967280 }
   0x5   :  { %15 = sfence }
   0x6   :  { %16 = vsyncpa [#allocation6], 0 }
   0x7   :  { %17 = vsyncpa [#allocation9], 0 }
   0x8   :  { %18 = vsyncpa [#allocation7], 0 }
   0x9   :  { %20 = vsyncpa [#allocation7 + $0x1], 0  ;;  %s706_s16 = smov 0   ;;  %s708_s17 = smov 0  }
   0xa   :  { %s710_s18 = smov 0   ;;  %s712_s19 = smov 0  }
   0xb   :  { %s714_s20 = smov 0   ;;  %s716_s0 = smov 0  }
   0xc LB: > { %s367_s21 = sadd.s32 4294967295, %s676_s0   ;;  %s368_s22 = sadd.s32 4294967294, %s676_s0   ;;  %s676_s0 = sphi %s716_s0, %s26_s0   ;;  %s672_s20 = sphi %s714_s20, %s866_s20   ;;  %s668_s19 = sphi %s712_s19, %s865_s19   ;;  %s664_s18 = sphi %s710_s18, %s864_s18   ;;  %s660_s17 = sphi %s708_s17, %s863_s17   ;;  %s656_s16 = sphi %s706_s16, %s862_s16  }
   0xd   : > { %s35_s23 = sadd.s32 1, %s672_s20  ;;  %s94_s24 = sadd.s32 1, %s664_s18 }
   0xe   : > { %p36_p0 = scmp.ge.s32.totalorder %s35_s23, 2  ;;  %p104_p1 = scmp.ne.s32.totalorder %s664_s18, %s660_s17 }
   0xf   : > { %p105_p2 = scmp.eq.s32.totalorder %s367_s21, 1  ;;  %p110_p3 = scmp.ne.s32.totalorder %s660_s17, %s656_s16 }
  0x10   : > { %s868_s23 = smov (%p36_p0, %s35_s23), 0  ;;  %p111_p5 = scmp.eq.s32.totalorder %s368_s22, 1 }
  0x11   : > { %p746_p4 = por %p105_p2, %p104_p1  ;;  %s89_s26 = ssub.s32 %s672_s20, %s868_s23 }
  0x12   : > { %p369_p6 = scmp.ge.s32.totalorder %s676_s0, 1  ;;  %p92_p7 = scmp.eq.s32.totalorder %s89_s26, 0 }
  0x13   : > { %p753_p8 = por %p111_p5, %p110_p3  ;;  %p118_p9 = scmp.lt.s32.totalorder %s676_s0, 3 }
  0x14   : > { %s759_s28 = scalar_select %p92_p7, %s664_s18, %s94_s24  }
  0x15   : > { %p761_p10 = pnand %p369_p6, %p118_p9  ;;  %p765_p11 = scmp.eq.s32.totalorder %s367_s21, 0 }
  0x16   : > { %s129_s6 = sshll.u32 %s855_s1, 4  ;;  %s679_s7 = smov [#allocation5]   ;;  %s130_s6 = int_to_ptr.hbm [resolvable:$true] %s129_s6 }
  0x17   : > { %p447_p12 = pneg %p761_p10  ;;  %s131_s8 = sshll.u32 %s679_s7, 4  ;;  %s132_s8 = int_to_ptr.vmem [resolvable:$true] %s131_s8 }
  0x18   : > { %s146_s11 = sshll.u32 %s856_s2, 4  ;;  %s680_s12 = smov 128   ;;  %s147_s11 = int_to_ptr.hbm [resolvable:$true] %s146_s11 }
  0x19   : > { %p448_p13 = pnand %p765_p11, %p447_p12  ;;  %s681_s13 = smov 8  }
  0x1a   : > { %s682_s14 = smov [#allocation8]   ;;  %161 = sbr.rel (%p761_p10) target bundleno = 82 (0x52), region = 28 }
  0x1b   : > { %450 = dma.hbm_to_vmem [thread:$0]  (!%p448_p13), %s130_s6, 1024, %s132_s8, [#allocation6], %s680_s12, %s680_s12, %s681_s13  }
  0x1c   : > { %s148_s15 = sshll.u32 %s682_s14, 4  ;;  %s149_s15 = int_to_ptr.vmem [resolvable:$true] %s148_s15 }
  0x1d   : > { %453 = dma.hbm_to_vmem [thread:$0]  (!%p448_p13), %s147_s11, 128, %s149_s15, [#allocation9]  }
  0x1f   : > { %643 = dma.done.wait (%p765_p11), [#allocation6], 1024  }
  0x20   : > { %645 = vsyncadd (%p765_p11), [#allocation6], 4294966272 }
  0x21   : > { %647 = dma.done.wait (%p765_p11), [#allocation9], 128  }
  0x22   : > { %649 = vsyncadd (%p765_p11), [#allocation9], 4294967168  ;;  %s790_s21 = sshll.u32 %s668_s19, 3  ;;  %v259_v8 = vld [vmem:[#allocation8] sm:$0xff] }
  0x23   : > { %s187_s22 = sld [smem:[#allocation4 + %s790_s21]]  ;;  %s195_s24 = sadd.s32 1, %s790_s21 }
  0x24   : > { %s196_s26 = sld [smem:[#allocation4 + %s195_s24]]  ;;  %s204_s29 = sadd.s32 2, %s790_s21 }
  0x25   : > { %s205_s4 = sld [smem:[#allocation4 + %s204_s29]]  ;;  %s213_s5 = sadd.s32 3, %s790_s21 }
  0x26   : > { %s796_s6 = sld [smem:[#allocation4 + %s213_s5]]  ;;  %s222_s30 = sadd.s32 4, %s790_s21 }
  0x27   : > { %s799_s7 = sld [smem:[#allocation4 + %s222_s30]]  ;;  %s231_s19 = sadd.s32 5, %s790_s21 }
  0x28   : > { %s802_s8 = sld [smem:[#allocation4 + %s231_s19]]  ;;  %s240_s9 = sadd.s32 6, %s790_s21 }
  0x29   : > { %p188_p0 = scmp.lt.s32.totalorder %s187_s22, 63  ;;  %p377_p1 = scmp.gt.s32.totalorder %s187_s22, 0 }
  0x2a   : > { %p197_p2 = scmp.lt.s32.totalorder %s196_s26, 63  ;;  %p382_p3 = scmp.gt.s32.totalorder %s196_s26, 0 }
  0x2b   : > { %s870_s22 = smov (!%p188_p0, %s187_s22), 63  ;;  %p206_p5 = scmp.lt.s32.totalorder %s205_s4, 63 }
  0x2c   : > { %s872_s26 = smov (!%p197_p2, %s196_s26), 63  ;;  %s874_s22 = smov (!%p377_p1, %s870_s22), 0 }
  0x2d   : > { %s876_s26 = smov (!%p382_p3, %s872_s26), 0  ;;  %s192_s10 = scalar_lea.vmem [#allocation5], %s874_s22 }
  0x2e   : > { %v193_v0 = vld [vmem:[%s192_s10] sm:$0x1]  ;;  %p387_p6 = scmp.gt.s32.totalorder %s205_s4, 0  ;;  %s201_s11 = scalar_lea.vmem [#allocation5], %s876_s26 }
  0x2f   : > { %194 = vst [vmem:[#allocation2] sm:$0x1] %v193_v0  ;;  %v202_v1 = vld [vmem:[%s201_s11] sm:$0x1]  ;;  %s878_s4 = smov (!%p206_p5, %s205_s4), 63  ;;  %p215_p7 = scmp.lt.s32.totalorder %s796_s6, 63 }
  0x30   : > { %203 = vst [vmem:[#allocation2 + $0x1] sm:$0x1] %v202_v1  ;;  %p392_p9 = scmp.gt.s32.totalorder %s796_s6, 0  ;;  %s880_s4 = smov (!%p387_p6, %s878_s4), 0 }
  0x31   : > { %s882_s6 = smov (!%p215_p7, %s796_s6), 63  ;;  %p224_p10 = scmp.lt.s32.totalorder %s799_s7, 63 }
  0x32   : > { %s210_s12 = scalar_lea.vmem [#allocation5], %s880_s4  ;;  %s884_s6 = smov (!%p392_p9, %s882_s6), 0 }
  0x33   : > { %v211_v2 = vld [vmem:[%s210_s12] sm:$0x1]  ;;  %s225_s13 = scalar_select %p224_p10, %s799_s7, 63 }
  0x34   : > { %212 = vst [vmem:[#allocation2 + $0x2] sm:$0x1] %v211_v2  ;;  %p397_p11 = scmp.gt.s32.totalorder %s799_s7, 0  ;;  %s219_s14 = scalar_lea.vmem [#allocation5], %s884_s6 }
  0x35   : > { %v220_v3 = vld [vmem:[%s219_s14] sm:$0x1]  ;;  %p233_p12 = scmp.lt.s32.totalorder %s802_s8, 63  ;;  %p402_p13 = scmp.gt.s32.totalorder %s802_s8, 0 }
  0x36   : > { %221 = vst [vmem:[#allocation2 + $0x3] sm:$0x1] %v220_v3  ;;  %s886_s13 = smov (!%p397_p11, %s225_s13), 0  ;;  %s241_s15 = sld [smem:[#allocation4 + %s240_s9]] }
  0x37   : > { %s888_s8 = smov (!%p233_p12, %s802_s8), 63  ;;  %s228_s22 = scalar_lea.vmem [#allocation5], %s886_s13 }
  0x38   : > { %v229_v4 = vld [vmem:[%s228_s22] sm:$0x1]  ;;  %s890_s8 = smov (!%p402_p13, %s888_s8), 0  ;;  %s249_s24 = sadd.s32 7, %s790_s21 }
  0x39   : > { %230 = vst [vmem:[#allocation2 + $0x4] sm:$0x1] %v229_v4  ;;  %s250_s26 = sld [smem:[#allocation4 + %s249_s24]]  ;;  %s237_s29 = scalar_lea.vmem [#allocation5], %s890_s8 }
  0x3a   : > { %v238_v5 = vld [vmem:[%s237_s29] sm:$0x1]  ;;  %s181_s4 = sand.u32 1, %s660_s17   ;;  %s274_s8 = scalar_lea.hbm %s857_s3, %s790_s21 }
  0x3b   : > { %239 = vst [vmem:[#allocation2 + $0x5] sm:$0x1] %v238_v5  ;;  %s375_s30 = sshll.u32 %s181_s4, 3  ;;  %s278_s11 = sshll.u32 %s274_s8, 4  ;;  %s279_s11 = int_to_ptr.hbm [resolvable:$true] %s278_s11 }
  0x3c   : > { %p242_p0 = scmp.lt.s32.totalorder %s241_s15, 63  ;;  %p407_p1 = scmp.gt.s32.totalorder %s241_s15, 0 }
  0x3d   : > { %s183_s9 = scalar_lea.vmem [#allocation10], %s375_s30  ;;  %s263_s12 = scalar_lea.sflag [#allocation7], %s181_s4 }
  0x3e   : > { %s892_s15 = smov (!%p242_p0, %s241_s15), 63  ;;  %s276_s10 = sshll.u32 %s183_s9, 4  ;;  %s277_s10 = int_to_ptr.vmem [resolvable:$true] %s276_s10 }
  0x3f   : > { %p251_p2 = scmp.lt.s32.totalorder %s250_s26, 63  ;;  %p412_p3 = scmp.gt.s32.totalorder %s250_s26, 0 }
  0x40   : > { %s894_s15 = smov (!%p407_p1, %s892_s15), 0  ;;  %s602_s13 = sshra.s32 %s279_s11, 4  ;;  %s603_s13 = int_to_ptr.hbm [resolvable:$true] %s602_s13 }
  0x41   : > { %s896_s26 = smov (!%p251_p2, %s250_s26), 63  ;;  %s246_s5 = scalar_lea.vmem [#allocation5], %s894_s15 }
  0x42   : > { %v247_v6 = vld [vmem:[%s246_s5] sm:$0x1]  ;;  %s898_s26 = smov (!%p412_p3, %s896_s26), 0  ;;  %s604_s14 = scalar_lea.hbm %s603_s13, 8 }
  0x43   : > { %248 = vst [vmem:[#allocation2 + $0x6] sm:$0x1] %v247_v6  ;;  %s255_s6 = scalar_lea.vmem [#allocation5], %s898_s26  ;;  %p605_p5 = scmp.ne.s32.totalorder %s603_s13, %s604_s14 }
  0x44   : > { %v256_v7 = vld [vmem:[%s255_s6] sm:$0x1]  ;;  %s608_s21 = scalar_lea.hbm %s857_s3, 16  ;;  %p609_p9 = scmp.lt.s32.totalorder %s603_s13, %s857_s3 }
  0x45   : > { %257 = vst [vmem:[#allocation2 + $0x7] sm:$0x1] %v256_v7  ;;  %p606_p6 = pnand %p605_p5, %p746_p4  ;;  %p610_p10 = scmp.lt.s32.totalorder %s608_s21, %s604_s14 }
  0x47   : > { %p607_p7 = pneg %p606_p6  ;;  %p611_p11 = por %p610_p10, %p609_p9 }
  0x49   : > { %p612_p12 = pnand %p611_p11, %p607_p7 }
  0x4c   : > { %v258_v9 = vld [vmem:[#allocation2] sm:$0xff] }
  0x4d   : > { %v260_v10 = vadd.f32 %v259_v8, %v258_v9 }
  0x4f   : > { %261 = vst [vmem:[%s183_s9] sm:$0xff] %v260_v10 }
  0x50   : > { %615 = shalt.err (!%p612_p12)
}
  0x51   : > { %445 = dma.vmem_to_hbm [thread:$0]  (%p746_p4), %s277_s10, 128, %s279_s11, %s263_s12  }
  0x52 PF: > { %p462_p13 = scmp.ge.s32.totalorder %s676_s0, 2  ;;  %s290_s29 = sand.u32 1, %s656_s16  }
  0x53   : > { %s291_s4 = scalar_lea.sflag [#allocation7], %s290_s29 }
  0x54   : > { %p455_p0 = pnand %p462_p13, %p753_p8 }
  0x56   : > { %p456_p1 = pneg %p455_p0 }
  0x58   : > { %651 = dma.done.wait (%p456_p1), %s291_s4, 128  }
  0x59   : > { %653 = vsyncadd (%p456_p1), %s291_s4, 4294967168  ;;  %s26_s0 = sadd.s32 1, %s676_s0   ;;  %s862_s16 = smov %s660_s17 }
  0x5a   : > { %p23_p2 = scmp.ge.s32.totalorder %s26_s0, 4   ;;  %s863_s17 = smov %s664_s18 }
  0x5b   : > { %s864_s18 = smov %s759_s28  ;;  %s865_s19 = smov %s672_s20 }
  0x5c   : > { %s866_s20 = smov %s868_s23  ;;  %25 = sbr.rel (!%p23_p2) target bundleno = 12 (0xc), region = 78 }
  0x61   :  { %297 = vsyncpa [#allocation6], 1 }
  0x62   :  { %299 = vsyncpa [#allocation6 + $0x1], 1 }
  0x63   :  { %300 = vsyncpa [#allocation9], 1 }
  0x64   :  { %301 = vsyncpa [#allocation7], 1 }
  0x65   :  { %303 = vsyncpa [#allocation7 + $0x1], 1 }

</bundles_post_ra>
